<compile_context>
chip_gen: v6e
topology: v6e:2x2x1
jax: 0.10.0
libtpu: 0.0.40
codegen_flags: <defaults>
</compile_context>

<pallas_src>
import jax
import jax.numpy as jnp
from jax.experimental import pallas as pl
from jax.experimental.pallas import tpu as pltpu


def _round_up(x, m):
    return ((x + m - 1) // m) * m


def _cdiv(a, b):
    return (a + b - 1) // b


def _default_vmem_limit_bytes():
    """Generation-aware scoped VMEM limit (v5e/v6e: 128 MiB phys, v7x: 64 MiB)."""
    cap = None
    try:
        cap = getattr(pltpu.get_tpu_info(), "vmem_capacity_bytes", None)
    except Exception:
        cap = None
    if not cap:
        return 48 << 20                         # safe everywhere (v7x: 64 MiB phys)
    return int(min(cap - cap // 4, 96 << 20))   # 25% headroom, 96 MiB max


def _make_row_kernel(inv_hw):
    """Whole H*W per block: one lane-axis reduction per row tile -> (tr, 1) out."""
    def kernel(x_ref, o_ref):
        s = jnp.sum(x_ref[...], axis=-1, keepdims=True, dtype=jnp.float32)
        o_ref[...] = (s * inv_hw).astype(o_ref.dtype)
    return kernel


def _make_lane_dense_kernel(inv_hw, tr):
    """Small H*W: per-row means emitted lane-dense, one output row per 128 input rows.

    Per-row sums naturally land one-per-sublane ((128, 1) columns).  Each 128-row
    chunk is relaid out to a (1, 128) lane vector using only lane-broadcast,
    diagonal select and a sublane reduce (VPU/XLU slots, which have slack here),
    so the final store is a single store per 128 rows instead of 16 masked ones.
    """
    n_chunks = tr // 128

    def kernel(x_ref, o_ref):
        # Constant diagonal mask, hoisted out of the chunk loop.
        row = jax.lax.broadcasted_iota(jnp.int32, (128, 128), 0)
        col = jax.lax.broadcasted_iota(jnp.int32, (128, 128), 1)
        diag = row == col

        def chunk(c, carry):
            r0 = pl.multiple_of(c * 128, 128)
            xc = x_ref[pl.ds(r0, 128), :]                                   # (128, HW)
            s = jnp.sum(xc, axis=-1, keepdims=True, dtype=jnp.float32)      # (128, 1)
            sb = jnp.broadcast_to(s, (128, 128))                            # lane bcast
            oc = jnp.sum(jnp.where(diag, sb, 0.0), axis=0, keepdims=True)   # (1, 128)
            o_ref[pl.ds(c, 1), :] = (oc * inv_hw).astype(o_ref.dtype)
            return carry

        jax.lax.fori_loop(0, n_chunks, chunk, 0, unroll=n_chunks <= 8)

    return kernel


def _make_acc_kernel(hw_total, thw, inv_hw):
    """H*W chunked along a trailing 'arbitrary' grid axis; f32 VMEM accumulator.

    The out-of-bounds lane mask is applied on the final (partial) chunk only.
    """
    mask_needed = (hw_total % thw) != 0

    def kernel(x_ref, o_ref, acc_ref):
        k = pl.program_id(1)
        last = pl.num_programs(1) - 1

        @pl.when(k == 0)
        def _():
            acc_ref[...] = jnp.zeros_like(acc_ref)

        if mask_needed:
            @pl.when(k != last)
            def _():
                acc_ref[...] += jnp.sum(x_ref[...], axis=-1, keepdims=True,
                                        dtype=jnp.float32)

            @pl.when(k == last)
            def _():
                x = x_ref[...]
                lane = jax.lax.broadcasted_iota(jnp.int32, x.shape, 1) + k * thw
                x = jnp.where(lane < hw_total, x, jnp.zeros_like(x))
                acc_ref[...] += jnp.sum(x, axis=-1, keepdims=True,
                                        dtype=jnp.float32)
        else:
            acc_ref[...] += jnp.sum(x_ref[...], axis=-1, keepdims=True,
                                    dtype=jnp.float32)

        @pl.when(k == last)
        def _():
            o_ref[...] = (acc_ref[...] * inv_hw).astype(o_ref.dtype)

    return kernel


def global_avg_pool2d(x,
                      *,
                      target_block_bytes=16 << 20,   # per input buffer (x2 double buffered)
                      vmem_limit_bytes=None,         # None -> generation-aware default
                      row_block=None,
                      hw_block=None,
                      lane_dense_max_lanes=256):
    """Equivalent of F.avg_pool2d(x, kernel_size=x.size()[2:]) for NCHW x."""
    assert x.ndim == 4, "expected NCHW input"
    assert jnp.issubdtype(x.dtype, jnp.floating), "avg_pool2d is float-only"
    N, C, H, W = x.shape
    HW = H * W
    rows = N * C
    x2d = x.reshape(rows, HW)                 # contiguous view, no HBM transpose pass
    inv_hw = 1.0 / float(HW)

    if vmem_limit_bytes is None:
        vmem_limit_bytes = _default_vmem_limit_bytes()
    # Input is double-buffered by the BlockSpec pipeline; keep 2*block (+slack)
    # under the scoped VMEM limit.
    block_budget = min(target_block_bytes,
                       max(1 << 20, vmem_limit_bytes // 2 - (4 << 20)))

    itemsize = jnp.dtype(x.dtype).itemsize
    sublane = max(8, 32 // itemsize)          # row granularity: 8 (f32), 16 (bf16)
    hw_lanes = _round_up(HW, 128)             # lane padding of the spatial axis in VMEM
    row_bytes = hw_lanes * itemsize           # VMEM bytes per (lane-padded) row

    # --- decide whether the spatial axis must be chunked ---------------------
    if hw_block is not None:
        assert hw_block == HW or hw_block % 128 == 0, "hw_block must be 128-aligned"
        chunk_hw = hw_block < HW
    else:
        chunk_hw = sublane * row_bytes > block_budget

    cost = pl.CostEstimate(flops=rows * HW, transcendentals=0,
                           bytes_accessed=rows * HW * itemsize + rows * itemsize)

    # --- lane-dense output path for small H*W --------------------------------
    use_lane_dense = (not chunk_hw and hw_lanes <= lane_dense_max_lanes
                      and row_block is None)
    if use_lane_dense:
        rows_pad = _round_up(rows, 128)
        tr_budget = max(128, (block_budget // row_bytes) // 128 * 128)
        if rows_pad <= min(1024, tr_budget):
            tr = rows_pad                          # single row tile
        else:
            # Multiple of 1024 keeps the (tr//128, 128) output block sublane-
            # aligned across >=2 row tiles; cap at ~half the rows so both v7x
            # TensorCores get work on the "parallel" axis.
            tr = max(1024, min((tr_budget // 1024) * 1024,
                               _round_up(_cdiv(rows, 2), 1024)))
        n_tiles = _cdiv(rows, tr)
        rows_out = n_tiles * tr

        out = pl.pallas_call(
            _make_lane_dense_kernel(inv_hw, tr),
            out_shape=jax.ShapeDtypeStruct((rows_out // 128, 128), x.dtype),
            grid_spec=pltpu.PrefetchScalarGridSpec(
                num_scalar_prefetch=0,
                grid=(n_tiles,),
                in_specs=[pl.BlockSpec((tr, HW), lambda i: (i, 0))],
                out_specs=pl.BlockSpec((tr // 128, 128), lambda i: (i, 0)),
            ),
            compiler_params=pltpu.CompilerParams(
                dimension_semantics=("parallel",),
                vmem_limit_bytes=vmem_limit_bytes,
            ),
            cost_estimate=cost,
        )(x2d)
        # Padded tail rows carry garbage means; slice them away (tiny array).
        return out.reshape(rows_out)[:rows].reshape(N, C, 1, 1)

    if not chunk_hw:
        # --- row-tiled, pipelined reduction over the full spatial axis -------
        if row_block is not None:
            assert row_block == rows or row_block % sublane == 0
            tr = rows if row_block >= rows else row_block
        else:
            tr_budget = max(sublane,
                            (block_budget // row_bytes) // sublane * sublane)
            if tr_budget >= rows:
                tr = rows
                if rows >= 2 * sublane:
                    # keep >=2 row blocks so both v7x TensorCores stream
                    tr = _round_up(_cdiv(rows, 2), sublane)
            else:
                tr = tr_budget

        grid = (_cdiv(rows, tr),)
        kernel = _make_row_kernel(inv_hw)
        in_specs = [pl.BlockSpec((tr, HW), lambda i: (i, 0))]
        out_specs = pl.BlockSpec((tr, 1), lambda i: (i, 0))
        scratch_shapes = []
        dim_sem = ("parallel",)
    else:
        # --- chunked spatial axis with an f32 VMEM accumulator ---------------
        if row_block is not None:
            assert row_block == rows or row_block % sublane == 0
            tr = rows if row_block >= rows else row_block
        else:
            tr = min(rows, 256)                    # favor thw when splitting budget
            if tr >= rows and rows >= 2 * sublane:
                tr = _round_up(_cdiv(rows, 2), sublane)   # >=2 blocks for v7x
        if hw_block is not None:
            thw = hw_block                         # explicit override honoured exactly
        else:
            # >=512 lanes keeps each strided DMA row segment >=2 KiB (f32)
            thw = max(512,
                      (block_budget // max(1, tr * itemsize)) // 128 * 128)
        thw = HW if thw >= HW else thw

        grid = (_cdiv(rows, tr), _cdiv(HW, thw))
        kernel = _make_acc_kernel(HW, thw, inv_hw)
        in_specs = [pl.BlockSpec((tr, thw), lambda i, k: (i, k))]
        out_specs = pl.BlockSpec((tr, 1), lambda i, k: (i, 0))
        scratch_shapes = [pltpu.VMEM((tr, 1), jnp.float32)]
        dim_sem = ("parallel", "arbitrary")        # reduction axis last

    out2d = pl.pallas_call(
        kernel,
        out_shape=jax.ShapeDtypeStruct((rows, 1), x.dtype),
        grid_spec=pltpu.PrefetchScalarGridSpec(
            num_scalar_prefetch=0,
            grid=grid,
            in_specs=in_specs,
            out_specs=out_specs,
            scratch_shapes=scratch_shapes,
        ),
        compiler_params=pltpu.CompilerParams(
            dimension_semantics=dim_sem,
            vmem_limit_bytes=vmem_limit_bytes,
        ),
        cost_estimate=cost,
    )(x2d)

    return out2d.reshape(N, C, 1, 1)


if __name__ == "__main__":
    key = jax.random.PRNGKey(0)
    k1, k2, k3, k4, k5, k6 = jax.random.split(key, 6)

    def check(x, atol=1e-5, rtol=1e-5, **kw):
        out = jax.block_until_ready(global_avg_pool2d(x, **kw))
        ref = jnp.mean(x.astype(jnp.float32), axis=(2, 3),
                       keepdims=True).astype(x.dtype)
        assert out.shape == ref.shape, (out.shape, ref.shape)
        assert out.dtype == x.dtype
        err = jnp.max(jnp.abs(out.astype(jnp.float32) - ref.astype(jnp.float32)))
        assert jnp.allclose(out.astype(jnp.float32), ref.astype(jnp.float32),
                            atol=atol, rtol=rtol), float(err)

    # 1) main case: lane-dense output path (H*W = 256 lanes), single row tile
    check(jax.random.normal(k1, (2, 4, 16, 16), dtype=jnp.float32))

    # 2) H*W not a multiple of 128 (7x7 head) -> lane-masked reduce, lane-dense out
    check(jax.random.normal(k2, (2, 4, 7, 7), dtype=jnp.float32))

    # 3) forced H*W chunking with a partial last chunk (400 = 3*128 + 16)
    #    -> accumulator path, lane mask gated to the final chunk only
    check(jax.random.normal(k3, (2, 4, 20, 20), dtype=jnp.float32), hw_block=128)

    # 4) explicit small row tile -> standard (tr, 1)-output path with a partial
    #    last row block (rows = 12, tr = 8)
    check(jax.random.normal(k4, (3, 4, 16, 16), dtype=jnp.float32), row_block=8)

    # 5) many rows, tiny H*W -> multi-tile lane-dense path (two 1024-row tiles,
    #    partial second tile, 8-chunk in-kernel relayout loop)
    check(jax.random.normal(k5, (2, 576, 7, 7), dtype=jnp.float32))

    # 6) bf16 input through the lane-dense path (f32 accumulation in-kernel)
    check(jax.random.normal(k6, (2, 4, 16, 16), dtype=jnp.bfloat16),
          atol=1e-2, rtol=1e-2)

    print("KERNEL_OK")
</pallas_src>

<mosaic_0001>
module attributes {stable_mosaic.version = 11 : i64} {
  func.func @kernel(%arg0: i32, %arg1: memref<128x256xf32, #tpu.memory_space<vmem>>, %arg2: memref<1x128xf32, #tpu.memory_space<vmem>>) attributes {dimension_semantics = [#tpu.dimension_semantics<parallel>], iteration_bounds = array<i64: 1>, scalar_prefetch = 0 : i64, scratch_operands = 0 : i64, tpu.core_type = #tpu.core_type<tc>, window_params = [{transform_indices = @transform_0, window_bounds = array<i64: 128, 256>}, {transform_indices = @transform_1, window_bounds = array<i64: 1, 128>}]} {
    %0 = tpu.iota {dimensions = array<i32: 0>} : vector<128x128xi32>
    %1 = tpu.iota {dimensions = array<i32: 1>} : vector<128x128xi32>
    %2 = arith.cmpi eq, %0, %1 : vector<128x128xi32>
    %c0_i32 = arith.constant 0 : i32
    %c128_i32 = arith.constant 128 : i32
    %3 = arith.muli %c0_i32, %c128_i32 : i32
    %4 = tpu.assume_multiple %3, 128 : i32
    %5 = arith.index_cast %4 : i32 to index
    %c0 = arith.constant 0 : index
    %6 = vector.load %arg1[%5, %c0] : memref<128x256xf32, #tpu.memory_space<vmem>>, vector<128x256xf32>
    %cst = arith.constant dense<0.000000e+00> : vector<128xf32>
    %7 = vector.multi_reduction <add>, %6, %cst [1] : vector<128x256xf32> to vector<128xf32>
    %8 = vector.shape_cast %7 : vector<128xf32> to vector<128x1xf32>
    %9 = vector.shape_cast %8 : vector<128x1xf32> to vector<128x1xf32>
    %10 = vector.broadcast %9 : vector<128x1xf32> to vector<128x128xf32>
    %cst_0 = arith.constant 0.000000e+00 : f32
    %11 = vector.broadcast %cst_0 : f32 to vector<128x128xf32>
    %12 = arith.select %2, %10, %11 : vector<128x128xi1>, vector<128x128xf32>
    %cst_1 = arith.constant dense<0.000000e+00> : vector<128xf32>
    %13 = vector.multi_reduction <add>, %12, %cst_1 [0] : vector<128x128xf32> to vector<128xf32>
    %14 = vector.shape_cast %13 : vector<128xf32> to vector<1x128xf32>
    %cst_2 = arith.constant 3.906250e-03 : f32
    %15 = vector.broadcast %cst_2 : f32 to vector<1x128xf32>
    %16 = arith.mulf %14, %15 : vector<1x128xf32>
    %17 = arith.index_cast %c0_i32 : i32 to index
    %c0_3 = arith.constant 0 : index
    %18 = vector.load %arg2[%17, %c0_3] : memref<1x128xf32, #tpu.memory_space<vmem>>, vector<1x128xf32>
    tpu.vector_store %arg2[%17, %c0_3], %16 {strides = array<i32>} : memref<1x128xf32, #tpu.memory_space<vmem>>, vector<1x128xf32>,
    %c1_i32 = arith.constant 1 : i32
    return
  }
  func.func @transform_0(%arg0: i32) -> (i32, i32) {
    %c0_i32 = arith.constant 0 : i32
    %c0_i32_0 = arith.constant 0 : i32
    return %arg0, %c0_i32 : i32, i32
  }
  func.func @transform_1(%arg0: i32) -> (i32, i32) {
    %c0_i32 = arith.constant 0 : i32
    %c0_i32_0 = arith.constant 0 : i32
    return %arg0, %c0_i32 : i32, i32
  }
}

</mosaic_0001>

<bundles_post_ra>
// kernel: tpu_custom_call.1
= control target key start
LH: loop header
LB: loop body
LE: loop exit
PB: predicated region body
PF: predicated region fallthrough
CT: control target
= control target key end

     0   :  { %6 = vsyncpa [#allocation3], 0  ;;  %s299_s0 = inlined_call_operand.hbm [shape: f32[8,256], index: 0, kind: input, shape index: {}]   ;;  %s300_s1 = inlined_call_operand.hbm [shape: f32[1,128], index: 1, kind: output, shape index: {}]  }
   0x1   :  { %7 = vsyncpa [#allocation4], 0 }
   0x2   :  { %12 = vsyncadd [#allocation3], 3840  ;;  %s243_s6 = smov [#allocation2]  }
   0x3   :  { %s13_s7 = sshll.u32 %s243_s6, 4  ;;  %s14_s7 = int_to_ptr.vmem [resolvable:$true] %s13_s7 }
   0x4   :  { %s207_s8 = scalar_lea.vmem %s14_s7, 256  ;;  %s211_s9 = scalar_lea.vmem %s14_s7, 4096 }
   0x5   :  { %p208_p0 = scmp.ne.s32.totalorder %s14_s7, %s207_s8  ;;  %p212_p1 = scmp.lt.s32.totalorder %s14_s7, %s14_s7 }
   0x6   :  { %p213_p2 = scmp.lt.s32.totalorder %s211_s9, %s207_s8 }
   0x8   :  { %p214_p3 = por %p213_p2, %p212_p1 }
   0xa   :  { %p215_p4 = pnand %p214_p3, %p208_p0 }
   0xc   :  { %218 = shalt.err (!%p215_p4)
}
   0xd   :  { %s244_s10 = smov 256   ;;  %s245_s11 = smov 16  }
   0xe   :  { %19 = dma.hbm_to_vmem [thread:$0]  %s299_s0, 256, %s14_s7, [#allocation3], %s244_s10, %s244_s10, %s245_s11  }
   0xf   :  { %239 = dma.done.wait [#allocation3], 4096  }
  0x10   :  { %240 = vsyncadd [#allocation3], 4294963200  ;;  %v61_v0 = vld [vmem:[#allocation2] sm:$0xff]  ;;  %v62_v1 = vld [vmem:[#allocation2 + $0x8] sm:$0xff]  ;;  %v23_v48 = vlaneseq  ;;  %s246_s0 = smov [#allocation5]  }
  0x11   :  { %v65_v2 = vld [vmem:[#allocation2 + $0x20] sm:$0xff]  ;;  %v93_v3 = vadd.f32 %v62_v1, %v61_v0  ;;  %v66_v4 = vld [vmem:[#allocation2 + $0x28] sm:$0xff]  ;;  %v63_v5 = vld [vmem:[#allocation2 + $0x10] sm:$0xff]  ;;  %s186_s14 = sshll.u32 %s246_s0, 4  ;;  %s187_s14 = int_to_ptr.vmem [resolvable:$true] %s186_s14 }
  0x12   :  { %v64_v6 = vld [vmem:[#allocation2 + $0x18] sm:$0xff]  ;;  %v99_v7 = vadd.f32 %v66_v4, %v65_v2  ;;  %v67_v8 = vld [vmem:[#allocation2 + $0x30] sm:$0xff]  ;;  %v69_v12 = vld [vmem:[#allocation2 + $0x40] sm:$0xff]  ;;  %v260_v49 = vshrl.u32 %v23_v48, 7  ;;  %v262_v50 = vand.u32 127, %v23_v48  ;;  %s219_s15 = scalar_lea.vmem %s187_s14, 16  ;;  %p224_p6 = scmp.lt.s32.totalorder %s187_s14, %s187_s14 }
  0x13   :  { %v68_v9 = vld [vmem:[#allocation2 + $0x38] sm:$0xff]  ;;  %94 = vadd.xlane.f32.xlu0 %v93_v3  ;;  %v96_v10 = vadd.f32 %v64_v6, %v63_v5  ;;  %v70_v13 = vld [vmem:[#allocation2 + $0x48] sm:$0xff]  ;;  %v71_v14 = vld [vmem:[#allocation2 + $0x50] sm:$0xff]  ;;  %p220_p5 = scmp.ne.s32.totalorder %s187_s14, %s219_s15  ;;  %s223_s16 = scalar_lea.vmem %s187_s14, 32 }
  0x14   :  { %100 = vadd.xlane.f32.xlu1 %v99_v7  ;;  %v102_v11 = vadd.f32 %v68_v9, %v67_v8  ;;  %v72_v15 = vld [vmem:[#allocation2 + $0x58] sm:$0xff]  ;;  %v105_v16 = vadd.f32 %v70_v13, %v69_v12  ;;  %v73_v18 = vld [vmem:[#allocation2 + $0x60] sm:$0xff]  ;;  %v74_v19 = vld [vmem:[#allocation2 + $0x68] sm:$0xff]  ;;  %v25_v51 = vadd.s32 8, %v260_v49  ;;  %v26_v53 = vadd.s32 16, %v260_v49  ;;  %p225_p7 = scmp.lt.s32.totalorder %s223_s16, %s219_s15 }
  0x15   :  { %v108_v17 = vadd.f32 %v72_v15, %v71_v14  ;;  %v75_v20 = vld [vmem:[#allocation2 + $0x70] sm:$0xff]  ;;  %v76_v21 = vld [vmem:[#allocation2 + $0x78] sm:$0xff]  ;;  %v111_v22 = vadd.f32 %v74_v19, %v73_v18  ;;  %v77_v24 = vld [vmem:[#allocation2 + $0x80] sm:$0xff]  ;;  %v27_v54 = vadd.s32 24, %v260_v49  ;;  %vm42_vm0 = vcmp.eq.s32.totalorder %v260_v49, %v262_v50 }
  0x16   :  { %v114_v23 = vadd.f32 %v76_v21, %v75_v20  ;;  %v78_v25 = vld [vmem:[#allocation2 + $0x88] sm:$0xff]  ;;  %v79_v26 = vld [vmem:[#allocation2 + $0x90] sm:$0xff]  ;;  %v80_v27 = vld [vmem:[#allocation2 + $0x98] sm:$0xff]  ;;  %vm43_vm1 = vcmp.eq.s32.totalorder %v25_v51, %v262_v50  ;;  %v28_v56 = vadd.s32 32, %v260_v49  ;;  %vm44_vm2 = vcmp.eq.s32.totalorder %v26_v53, %v262_v50  ;;  %p226_p8 = por %p225_p7, %p224_p6 }
  0x17   :  { %97 = vadd.xlane.f32.xlu0 %v96_v10  ;;  %v117_v28 = vadd.f32 %v78_v25, %v77_v24  ;;  %v120_v29 = vadd.f32 %v80_v27, %v79_v26  ;;  %v81_v30 = vld [vmem:[#allocation2 + $0xa0] sm:$0xff]  ;;  %v82_v31 = vld [vmem:[#allocation2 + $0xa8] sm:$0xff]  ;;  %v83_v32 = vld [vmem:[#allocation2 + $0xb0] sm:$0xff]  ;;  %vm45_vm3 = vcmp.eq.s32.totalorder %v27_v54, %v262_v50  ;;  %v29_v58 = vadd.s32 40, %v260_v49 }
  0x18   :  { %103 = vadd.xlane.f32.xlu1 %v102_v11  ;;  %v84_v33 = vld [vmem:[#allocation2 + $0xb8] sm:$0xff]  ;;  %v123_v34 = vadd.f32 %v82_v31, %v81_v30  ;;  %v85_v36 = vld [vmem:[#allocation2 + $0xc0] sm:$0xff]  ;;  %v86_v37 = vld [vmem:[#allocation2 + $0xc8] sm:$0xff]  ;;  %vm46_vm4 = vcmp.eq.s32.totalorder %v28_v56, %v262_v50  ;;  %v30_v63 = vadd.s32 48, %v260_v49  ;;  %v31_v4 = vadd.s32 56, %v260_v49  ;;  %p227_p9 = pnand %p226_p8, %p220_p5 }
  0x19   :  { %v126_v35 = vadd.f32 %v84_v33, %v83_v32  ;;  %v87_v38 = vld [vmem:[#allocation2 + $0xd0] sm:$0xff]  ;;  %v88_v39 = vld [vmem:[#allocation2 + $0xd8] sm:$0xff]  ;;  %v129_v40 = vadd.f32 %v86_v37, %v85_v36  ;;  %v89_v42 = vld [vmem:[#allocation2 + $0xe0] sm:$0xff]  ;;  %vm47_vm5 = vcmp.eq.s32.totalorder %v29_v58, %v262_v50  ;;  %v32_v8 = vadd.s32 64, %v260_v49 }
  0x1a   :  { %v132_v41 = vadd.f32 %v88_v39, %v87_v38  ;;  %v90_v43 = vld [vmem:[#allocation2 + $0xe8] sm:$0xff]  ;;  %v91_v44 = vld [vmem:[#allocation2 + $0xf0] sm:$0xff]  ;;  %v92_v45 = vld [vmem:[#allocation2 + $0xf8] sm:$0xff]  ;;  %vm48_vm6 = vcmp.eq.s32.totalorder %v30_v63, %v262_v50  ;;  %vm49_vm7 = vcmp.eq.s32.totalorder %v31_v4, %v262_v50  ;;  %v33_v12 = vadd.s32 72, %v260_v49 }
  0x1b   :  { %106 = vadd.xlane.f32.xlu0 %v105_v16  ;;  %v135_v46 = vadd.f32 %v90_v43, %v89_v42  ;;  %v138_v47 = vadd.f32 %v92_v45, %v91_v44  ;;  %vm50_vm8 = vcmp.eq.s32.totalorder %v32_v8, %v262_v50  ;;  %v34_v16 = vadd.s32 80, %v260_v49 }
  0x1c   :  { %109 = vadd.xlane.f32.xlu1 %v108_v17  ;;  %vm51_vm9 = vcmp.eq.s32.totalorder %v33_v12, %v262_v50  ;;  %v35_v20 = vadd.s32 88, %v260_v49  ;;  %v36_v24 = vadd.s32 96, %v260_v49  ;;  %v38_v32 = vadd.s32 112, %v260_v49 }
  0x1d   :  { %vm52_vm10 = vcmp.eq.s32.totalorder %v34_v16, %v262_v50  ;;  %v39_v36 = vadd.s32 120, %v260_v49 }
  0x1e   :  { %vm53_vm11 = vcmp.eq.s32.totalorder %v35_v20, %v262_v50  ;;  %vm54_vm12 = vcmp.eq.s32.totalorder %v36_v24, %v262_v50  ;;  %vm56_vm14 = vcmp.eq.s32.totalorder %v38_v32, %v262_v50 }
  0x1f   :  { %112 = vadd.xlane.f32.xlu0 %v111_v22  ;;  %vm57_vm15 = vcmp.eq.s32.totalorder %v39_v36, %v262_v50 }
  0x20   :  { %115 = vadd.xlane.f32.xlu1 %v114_v23 }
  0x23   :  { %118 = vadd.xlane.f32.xlu0 %v117_v28  ;;  %v37_v28 = vadd.s32 104, %v260_v49 }
  0x24   :  { %121 = vadd.xlane.f32.xlu1 %v120_v29 }
  0x25   :  { %vm55_vm13 = vcmp.eq.s32.totalorder %v37_v28, %v262_v50 }
  0x27   :  { %124 = vadd.xlane.f32.xlu0 %v123_v34 }
  0x28   :  { %127 = vadd.xlane.f32.xlu1 %v126_v35 }
  0x2b   :  { %130 = vadd.xlane.f32.xlu0 %v129_v40 }
  0x2c   :  { %133 = vadd.xlane.f32.xlu1 %v132_v41 }
  0x2f   :  { %136 = vadd.xlane.f32.xlu0 %v135_v46 }
  0x30   :  { %139 = vadd.xlane.f32.xlu1 %v138_v47 }
  0x9c   :  { %v95_v52 = vpop.xlane.xlu0 %94 }
  0x9d   :  { %v101_v55 = vpop.xlane.xlu1 %100  ;;  %v141_v59 = vsel %vm42_vm0, %v95_v52, 0.0 }
  0x9e   :  { %v143_v0 = vsel %vm44_vm2, %v101_v55, 0.0 }
  0xa0   :  { %v98_v57 = vpop.xlane.xlu0 %97 }
  0xa1   :  { %v142_v60 = vsel %vm43_vm1, %v98_v57, 0.0  ;;  %v104_v61 = vpop.xlane.xlu1 %103 }
  0xa2   :  { %v157_v62 = vadd.f32 %v142_v60, %v141_v59  ;;  %v144_v1 = vsel %vm45_vm3, %v104_v61, 0.0 }
  0xa4   :  { %v158_v2 = vadd.f32 %v157_v62, %v143_v0  ;;  %v107_v3 = vpop.xlane.xlu0 %106 }
  0xa5   :  { %v145_v5 = vsel %vm46_vm4, %v107_v3, 0.0  ;;  %v110_v6 = vpop.xlane.xlu1 %109 }
  0xa6   :  { %v159_v7 = vadd.f32 %v158_v2, %v144_v1  ;;  %v146_v9 = vsel %vm47_vm5, %v110_v6, 0.0 }
  0xa8   :  { %v160_v10 = vadd.f32 %v159_v7, %v145_v5  ;;  %v113_v11 = vpop.xlane.xlu0 %112 }
  0xa9   :  { %v147_v13 = vsel %vm48_vm6, %v113_v11, 0.0  ;;  %v116_v14 = vpop.xlane.xlu1 %115 }
  0xaa   :  { %v161_v15 = vadd.f32 %v160_v10, %v146_v9  ;;  %v148_v17 = vsel %vm49_vm7, %v116_v14, 0.0 }
  0xac   :  { %v162_v18 = vadd.f32 %v161_v15, %v147_v13  ;;  %v119_v19 = vpop.xlane.xlu0 %118 }
  0xad   :  { %v149_v21 = vsel %vm50_vm8, %v119_v19, 0.0  ;;  %v122_v22 = vpop.xlane.xlu1 %121 }
  0xae   :  { %v163_v23 = vadd.f32 %v162_v18, %v148_v17  ;;  %v150_v25 = vsel %vm51_vm9, %v122_v22, 0.0 }
  0xb0   :  { %v164_v26 = vadd.f32 %v163_v23, %v149_v21  ;;  %v125_v27 = vpop.xlane.xlu0 %124 }
  0xb1   :  { %v151_v29 = vsel %vm52_vm10, %v125_v27, 0.0  ;;  %v128_v30 = vpop.xlane.xlu1 %127 }
  0xb2   :  { %v165_v31 = vadd.f32 %v164_v26, %v150_v25  ;;  %v152_v33 = vsel %vm53_vm11, %v128_v30, 0.0 }
  0xb4   :  { %v166_v34 = vadd.f32 %v165_v31, %v151_v29  ;;  %v131_v35 = vpop.xlane.xlu0 %130 }
  0xb5   :  { %v153_v37 = vsel %vm54_vm12, %v131_v35, 0.0  ;;  %v134_v38 = vpop.xlane.xlu1 %133 }
  0xb6   :  { %v167_v39 = vadd.f32 %v166_v34, %v152_v33  ;;  %v154_v40 = vsel %vm55_vm13, %v134_v38, 0.0 }
  0xb8   :  { %v168_v41 = vadd.f32 %v167_v39, %v153_v37  ;;  %v137_v42 = vpop.xlane.xlu0 %136 }
  0xb9   :  { %v155_v43 = vsel %vm56_vm14, %v137_v42, 0.0  ;;  %v140_v44 = vpop.xlane.xlu1 %139 }
  0xba   :  { %v169_v45 = vadd.f32 %v168_v41, %v154_v40  ;;  %v156_v46 = vsel %vm57_vm15, %v140_v44, 0.0 }
  0xbc   :  { %v170_v47 = vadd.f32 %v169_v45, %v155_v43 }
  0xbe   :  { %v171_v48 = vadd.f32 %v170_v47, %v156_v46 }
  0xc0   :  { %v172_v51 = vrot.slane %v171_v48, 4 }
  0xc2   :  { %v173_v52 = vadd.f32 %v172_v51, %v171_v48 }
  0xc4   :  { %v174_v53 = vrot.slane %v173_v52, 2 }
  0xc6   :  { %v175_v49 = vadd.f32 %v174_v53, %v173_v52 }
  0xc8   :  { %v176_v54 = vrot.slane %v175_v49, 1 }
  0xca   :  { %v177_v55 = vadd.f32 %v176_v54, %v175_v49 }
  0xcc   :  { %v178_v56 = vmul.f32 0.00390625, %v177_v55 }
  0xce   :  { %179 = vst [vmem:[#allocation5] sm:$0x1] %v178_v56 }
  0xcf   :  { %230 = shalt.err (!%p227_p9)
}
  0xd0   :  { %189 = dma.vmem_to_hbm [thread:$0]  %s187_s14, 16, %s300_s1, [#allocation4]  }
  0xd1   :  { %241 = dma.done.wait [#allocation4], 16  }
  0xd2   :  { %242 = vsyncadd [#allocation4], 4294967280 }
  0xd3   :  { %193 = vsyncpa [#allocation3], 1 }
  0xd4   :  { %194 = vsyncpa [#allocation4], 1 }

</bundles_post_ra>
